<compile_context>
chip_gen: v5e
topology: v5e:2x2
jax: 0.10.0
libtpu: 0.0.40
codegen_flags: <defaults>
</compile_context>

<pallas_src>
import functools

import jax
import jax.numpy as jnp
from jax.experimental import pallas as pl
from jax.experimental.pallas import tpu as pltpu


def _mlp_kernel(x_ref, *refs, n_layers):
    """Forward pass on one lane-dense tile of the batch.

    x_ref: (in_dim, T); refs = (w0, b0, w1, b1, ..., w_{L-1}, b_{L-1}, out_ref)
    with w_i: (fan_out, fan_in), b_i: (fan_out, 1), out_ref: (out_dim, T).
    """
    out_ref = refs[-1]
    param_refs = refs[:-1]

    x = x_ref[...].astype(jnp.float32)                       # (in_dim, T)
    for i in range(n_layers):
        w = param_refs[2 * i][...].astype(jnp.float32)       # (f_out, f_in)
        b = param_refs[2 * i + 1][...].astype(jnp.float32)   # (f_out, 1)
        f_in = w.shape[1]
        if i == 0 and f_in <= 4:
            # Tiny contraction (K = 2): two VPU broadcast multiply-adds are
            # cheaper than an almost-empty MXU push/pop, and free the vex slot.
            z = b
            for k in range(f_in):
                z = z + w[:, k:k + 1] * x[k:k + 1, :]
        else:
            z = jnp.dot(w, x, preferred_element_type=jnp.float32) + b
        x = jnp.tanh(z) if i < n_layers - 1 else z
    out_ref[...] = x.astype(out_ref.dtype)


def pinn_ez_forward(coords, weights, biases, *, row_tile=2048):
    """coords: (N, in_dim) f32; weights[i]: (fan_out, fan_in) (PyTorch layout);
    biases[i]: (fan_out,).  Returns (N, out_dim)."""
    n, in_dim = coords.shape
    n_layers = len(weights)
    out_dim = weights[-1].shape[0]

    # Clamp the tile so tiny problems don't pad excessively, keep it a
    # multiple of 128, and pad N so the grid divides evenly.
    row_tile = min(row_tile, pl.cdiv(n, 128) * 128)
    n_pad = pl.cdiv(n, row_tile) * row_tile

    x_t = coords.T                                           # (in_dim, N)
    if n_pad != n:
        x_t = jnp.pad(x_t, ((0, 0), (0, n_pad - n)))

    grid = (n_pad // row_tile,)

    # coords tiled over the lane (batch) axis; each weight/bias passed whole.
    in_specs = [pl.BlockSpec((in_dim, row_tile), lambda i: (0, i))]
    flat_params = []
    for w, b in zip(weights, biases):
        b2 = b.reshape(b.shape[0], 1)        # 2-D bias: clean (sublane, lane)
        in_specs.append(pl.BlockSpec(w.shape, lambda i: (0, 0)))
        in_specs.append(pl.BlockSpec(b2.shape, lambda i: (0, 0)))
        flat_params.extend([w, b2])

    out_specs = pl.BlockSpec((out_dim, row_tile), lambda i: (0, i))

    kernel = functools.partial(_mlp_kernel, n_layers=n_layers)

    out_t = pl.pallas_call(
        kernel,
        out_shape=jax.ShapeDtypeStruct((out_dim, n_pad), coords.dtype),
        grid_spec=pltpu.PrefetchScalarGridSpec(
            num_scalar_prefetch=0,
            grid=grid,
            in_specs=in_specs,
            out_specs=out_specs,
        ),
        compiler_params=pltpu.CompilerParams(
            dimension_semantics=("parallel",),
        ),
    )(x_t, *flat_params)

    return out_t[:, :n].T                                    # (N, out_dim)


def init_params(layers, key):
    """Mirror nn.Linear default init U(-1/sqrt(fan_in), 1/sqrt(fan_in));
    weights kept in PyTorch layout (fan_out, fan_in)."""
    weights, biases = [], []
    for i in range(len(layers) - 1):
        fan_in, fan_out = layers[i], layers[i + 1]
        key, kw, kb = jax.random.split(key, 3)
        bound = 1.0 / jnp.sqrt(jnp.float32(fan_in))
        w = jax.random.uniform(kw, (fan_out, fan_in), jnp.float32, -bound, bound)
        b = jax.random.uniform(kb, (fan_out,), jnp.float32, -bound, bound)
        weights.append(w)
        biases.append(b)
    return weights, biases


def reference_forward(coords, weights, biases):
    x = coords
    for i, (w, b) in enumerate(zip(weights, biases)):
        x = x @ w.T + b
        if i < len(weights) - 1:
            x = jnp.tanh(x)
    return x


if __name__ == "__main__":
    key = jax.random.PRNGKey(0)
    layers = [2, 32, 32, 32, 1]  # (x, y) -> hidden -> E_z

    k_params, k_coords = jax.random.split(key)
    weights, biases = init_params(layers, k_params)

    n = 520  # not a multiple of the tile -> exercises padding + multi-step grid
    coords = jax.random.uniform(k_coords, (n, 2), jnp.float32, -1.0, 1.0)

    ez = pinn_ez_forward(coords, weights, biases, row_tile=256)
    ez = jax.block_until_ready(ez)

    ez_ref = reference_forward(coords, weights, biases)
    assert ez.shape == (n, 1), ez.shape
    assert jnp.allclose(ez, ez_ref, atol=1e-5, rtol=1e-5), (
        float(jnp.max(jnp.abs(ez - ez_ref)))
    )

    print("KERNEL_OK")
</pallas_src>

<mosaic_0001>
module attributes {stable_mosaic.version = 11 : i64} {
  func.func @_mlp_kernel(%arg0: i32, %arg1: memref<2x256xf32, #tpu.memory_space<vmem>>, %arg2: memref<32x2xf32, #tpu.memory_space<vmem>>, %arg3: memref<32x1xf32, #tpu.memory_space<vmem>>, %arg4: memref<32x32xf32, #tpu.memory_space<vmem>>, %arg5: memref<32x1xf32, #tpu.memory_space<vmem>>, %arg6: memref<32x32xf32, #tpu.memory_space<vmem>>, %arg7: memref<32x1xf32, #tpu.memory_space<vmem>>, %arg8: memref<1x32xf32, #tpu.memory_space<vmem>>, %arg9: memref<1x1xf32, #tpu.memory_space<vmem>>, %arg10: memref<1x256xf32, #tpu.memory_space<vmem>>) attributes {dimension_semantics = [#tpu.dimension_semantics<parallel>], iteration_bounds = array<i64: 3>, scalar_prefetch = 0 : i64, scratch_operands = 0 : i64, tpu.core_type = #tpu.core_type<tc>, window_params = [{transform_indices = @transform_0, window_bounds = array<i64: 2, 256>}, {pipeline_mode = #tpu.pipeline_mode<synchronous>, transform_indices = @transform_1, window_bounds = array<i64: 32, 2>}, {pipeline_mode = #tpu.pipeline_mode<synchronous>, transform_indices = @transform_2, window_bounds = array<i64: 32, 1>}, {pipeline_mode = #tpu.pipeline_mode<synchronous>, transform_indices = @transform_3, window_bounds = array<i64: 32, 32>}, {pipeline_mode = #tpu.pipeline_mode<synchronous>, transform_indices = @transform_4, window_bounds = array<i64: 32, 1>}, {pipeline_mode = #tpu.pipeline_mode<synchronous>, transform_indices = @transform_5, window_bounds = array<i64: 32, 32>}, {pipeline_mode = #tpu.pipeline_mode<synchronous>, transform_indices = @transform_6, window_bounds = array<i64: 32, 1>}, {pipeline_mode = #tpu.pipeline_mode<synchronous>, transform_indices = @transform_7, window_bounds = array<i64: 1, 32>}, {pipeline_mode = #tpu.pipeline_mode<synchronous>, transform_indices = @transform_8, window_bounds = array<i64: 1, 1>}, {transform_indices = @transform_9, window_bounds = array<i64: 1, 256>}]} {
    %c0 = arith.constant 0 : index
    %c0_0 = arith.constant 0 : index
    %0 = vector.load %arg1[%c0, %c0_0] : memref<2x256xf32, #tpu.memory_space<vmem>>, vector<2x256xf32>
    %c0_1 = arith.constant 0 : index
    %c0_2 = arith.constant 0 : index
    %1 = vector.load %arg2[%c0_1, %c0_2] : memref<32x2xf32, #tpu.memory_space<vmem>>, vector<32x2xf32>
    %c0_3 = arith.constant 0 : index
    %c0_4 = arith.constant 0 : index
    %2 = vector.load %arg3[%c0_3, %c0_4] : memref<32x1xf32, #tpu.memory_space<vmem>>, vector<32x1xf32>
    %3 = vector.extract_strided_slice %1 {offsets = [0, 0], sizes = [32, 1], strides = [1, 1]} : vector<32x2xf32> to vector<32x1xf32>
    %4 = vector.extract_strided_slice %0 {offsets = [0, 0], sizes = [1, 256], strides = [1, 1]} : vector<2x256xf32> to vector<1x256xf32>
    %5 = vector.broadcast %3 : vector<32x1xf32> to vector<32x256xf32>
    %6 = vector.broadcast %4 : vector<1x256xf32> to vector<32x256xf32>
    %7 = arith.mulf %5, %6 : vector<32x256xf32>
    %8 = vector.broadcast %2 : vector<32x1xf32> to vector<32x256xf32>
    %9 = arith.addf %8, %7 : vector<32x256xf32>
    %10 = vector.extract_strided_slice %1 {offsets = [0, 1], sizes = [32, 1], strides = [1, 1]} : vector<32x2xf32> to vector<32x1xf32>
    %11 = vector.extract_strided_slice %0 {offsets = [1, 0], sizes = [1, 256], strides = [1, 1]} : vector<2x256xf32> to vector<1x256xf32>
    %12 = vector.broadcast %10 : vector<32x1xf32> to vector<32x256xf32>
    %13 = vector.broadcast %11 : vector<1x256xf32> to vector<32x256xf32>
    %14 = arith.mulf %12, %13 : vector<32x256xf32>
    %15 = arith.addf %9, %14 : vector<32x256xf32>
    %16 = math.tanh %15 : vector<32x256xf32>
    %c0_5 = arith.constant 0 : index
    %c0_6 = arith.constant 0 : index
    %17 = vector.load %arg4[%c0_5, %c0_6] : memref<32x32xf32, #tpu.memory_space<vmem>>, vector<32x32xf32>
    %c0_7 = arith.constant 0 : index
    %c0_8 = arith.constant 0 : index
    %18 = vector.load %arg5[%c0_7, %c0_8] : memref<32x1xf32, #tpu.memory_space<vmem>>, vector<32x1xf32>
    %cst = arith.constant dense<0.000000e+00> : vector<32x256xf32>
    %19 = tpu.matmul %17, %16, %cst {dimension_numbers = #tpu.dot_dimension_numbers<[1], [0], [0], [1], [0, 0, 1, 1], [], []>} : vector<32x32xf32>, vector<32x256xf32>, vector<32x256xf32> -> vector<32x256xf32>
    %20 = vector.broadcast %18 : vector<32x1xf32> to vector<32x256xf32>
    %21 = arith.addf %19, %20 : vector<32x256xf32>
    %22 = math.tanh %21 : vector<32x256xf32>
    %c0_9 = arith.constant 0 : index
    %c0_10 = arith.constant 0 : index
    %23 = vector.load %arg6[%c0_9, %c0_10] : memref<32x32xf32, #tpu.memory_space<vmem>>, vector<32x32xf32>
    %c0_11 = arith.constant 0 : index
    %c0_12 = arith.constant 0 : index
    %24 = vector.load %arg7[%c0_11, %c0_12] : memref<32x1xf32, #tpu.memory_space<vmem>>, vector<32x1xf32>
    %cst_13 = arith.constant dense<0.000000e+00> : vector<32x256xf32>
    %25 = tpu.matmul %23, %22, %cst_13 {dimension_numbers = #tpu.dot_dimension_numbers<[1], [0], [0], [1], [0, 0, 1, 1], [], []>} : vector<32x32xf32>, vector<32x256xf32>, vector<32x256xf32> -> vector<32x256xf32>
    %26 = vector.broadcast %24 : vector<32x1xf32> to vector<32x256xf32>
    %27 = arith.addf %25, %26 : vector<32x256xf32>
    %28 = math.tanh %27 : vector<32x256xf32>
    %c0_14 = arith.constant 0 : index
    %c0_15 = arith.constant 0 : index
    %29 = vector.load %arg8[%c0_14, %c0_15] : memref<1x32xf32, #tpu.memory_space<vmem>>, vector<1x32xf32>
    %c0_16 = arith.constant 0 : index
    %c0_17 = arith.constant 0 : index
    %30 = vector.load %arg9[%c0_16, %c0_17] : memref<1x1xf32, #tpu.memory_space<vmem>>, vector<1x1xf32>
    %cst_18 = arith.constant dense<0.000000e+00> : vector<1x256xf32>
    %31 = tpu.matmul %29, %28, %cst_18 {dimension_numbers = #tpu.dot_dimension_numbers<[1], [0], [0], [1], [0, 0, 1, 1], [], []>} : vector<1x32xf32>, vector<32x256xf32>, vector<1x256xf32> -> vector<1x256xf32>
    %32 = vector.broadcast %30 : vector<1x1xf32> to vector<1x256xf32>
    %33 = arith.addf %31, %32 : vector<1x256xf32>
    %c0_19 = arith.constant 0 : index
    %c0_20 = arith.constant 0 : index
    %34 = vector.load %arg10[%c0_19, %c0_20] : memref<1x256xf32, #tpu.memory_space<vmem>>, vector<1x256xf32>
    tpu.vector_store %arg10[%c0_19, %c0_20], %33 {strides = array<i32>} : memref<1x256xf32, #tpu.memory_space<vmem>>, vector<1x256xf32>,
    return
  }
  func.func @transform_0(%arg0: i32) -> (i32, i32) {
    %c0_i32 = arith.constant 0 : i32
    %c0_i32_0 = arith.constant 0 : i32
    return %c0_i32, %arg0 : i32, i32
  }
  func.func @transform_1(%arg0: i32) -> (i32, i32) {
    %c0_i32 = arith.constant 0 : i32
    %c0_i32_0 = arith.constant 0 : i32
    %c0_i32_1 = arith.constant 0 : i32
    return %c0_i32, %c0_i32_0 : i32, i32
  }
  func.func @transform_2(%arg0: i32) -> (i32, i32) {
    %c0_i32 = arith.constant 0 : i32
    %c0_i32_0 = arith.constant 0 : i32
    %c0_i32_1 = arith.constant 0 : i32
    return %c0_i32, %c0_i32_0 : i32, i32
  }
  func.func @transform_3(%arg0: i32) -> (i32, i32) {
    %c0_i32 = arith.constant 0 : i32
    %c0_i32_0 = arith.constant 0 : i32
    %c0_i32_1 = arith.constant 0 : i32
    return %c0_i32, %c0_i32_0 : i32, i32
  }
  func.func @transform_4(%arg0: i32) -> (i32, i32) {
    %c0_i32 = arith.constant 0 : i32
    %c0_i32_0 = arith.constant 0 : i32
    %c0_i32_1 = arith.constant 0 : i32
    return %c0_i32, %c0_i32_0 : i32, i32
  }
  func.func @transform_5(%arg0: i32) -> (i32, i32) {
    %c0_i32 = arith.constant 0 : i32
    %c0_i32_0 = arith.constant 0 : i32
    %c0_i32_1 = arith.constant 0 : i32
    return %c0_i32, %c0_i32_0 : i32, i32
  }
  func.func @transform_6(%arg0: i32) -> (i32, i32) {
    %c0_i32 = arith.constant 0 : i32
    %c0_i32_0 = arith.constant 0 : i32
    %c0_i32_1 = arith.constant 0 : i32
    return %c0_i32, %c0_i32_0 : i32, i32
  }
  func.func @transform_7(%arg0: i32) -> (i32, i32) {
    %c0_i32 = arith.constant 0 : i32
    %c0_i32_0 = arith.constant 0 : i32
    %c0_i32_1 = arith.constant 0 : i32
    return %c0_i32, %c0_i32_0 : i32, i32
  }
  func.func @transform_8(%arg0: i32) -> (i32, i32) {
    %c0_i32 = arith.constant 0 : i32
    %c0_i32_0 = arith.constant 0 : i32
    %c0_i32_1 = arith.constant 0 : i32
    return %c0_i32, %c0_i32_0 : i32, i32
  }
  func.func @transform_9(%arg0: i32) -> (i32, i32) {
    %c0_i32 = arith.constant 0 : i32
    %c0_i32_0 = arith.constant 0 : i32
    return %c0_i32, %arg0 : i32, i32
  }
}

</mosaic_0001>

<bundles_post_ra>
// kernel: tpu_custom_call.1
= control target key start
LH: loop header
LB: loop body
LE: loop exit
PB: predicated region body
PF: predicated region fallthrough
CT: control target
= control target key end

     0   :  { %s1231_s0 = inlined_call_operand.vmem [shape: f32[2,768], index: 0, kind: input, shape index: {}]   ;;  %s1232_s1 = inlined_call_operand.vmem [shape: f32[32,2], index: 1, kind: input, shape index: {}]   ;;  %s1233_s2 = inlined_call_operand.vmem [shape: f32[32,1], index: 2, kind: input, shape index: {}]   ;;  %s1234_s3 = inlined_call_operand.vmem [shape: f32[32,32], index: 3, kind: input, shape index: {}]   ;;  %s1235_s4 = inlined_call_operand.vmem [shape: f32[32,1], index: 4, kind: input, shape index: {}]   ;;  %s1236_s5 = inlined_call_operand.vmem [shape: f32[32,32], index: 5, kind: input, shape index: {}]   ;;  %s1237_s6 = inlined_call_operand.vmem [shape: f32[32,1], index: 6, kind: input, shape index: {}]   ;;  %s1238_s7 = inlined_call_operand.vmem [shape: f32[1,32], index: 7, kind: input, shape index: {}]   ;;  %s1239_s8 = inlined_call_operand.<no memory space> [shape: f32[1,1], index: 8, kind: input, shape index: {}]   ;;  %s1240_s9 = inlined_call_operand.hbm [shape: f32[1,768], index: 9, kind: output, shape index: {}]  }
   0x1   :  { %v14_v0 = vstv %s1239_s8 }
   0x2   :  { %15 = vst [vmem:[#allocation2] sm:$0x1] %v14_v0 }
   0x3   :  { %16 = vsyncpa [#allocation4], 0 }
   0x4   :  { %18 = vsyncpa [#allocation4 + $0x1], 0  ;;  %s1050_s11 = smov 0   ;;  %s1052_s12 = smov 0  }
   0x5   :  { %s1054_s13 = smov 0   ;;  %s1056_s14 = smov 0  }
   0x6 LB: > { %s803_s8 = sadd.s32 4294967295, %s993_s14   ;;  %s804_s15 = sadd.s32 4294967294, %s993_s14   ;;  %s993_s14 = sphi %s1056_s14, %s1246_s14   ;;  %s989_s13 = sphi %s1054_s13, %s1245_s13   ;;  %s985_s12 = sphi %s1052_s12, %s1244_s12   ;;  %s981_s11 = sphi %s1050_s11, %s1243_s11  }
   0x7   : > { %s1073_s16 = sadd.s32 1, %s993_s14   ;;  %s225_s17 = sadd.s32 1, %s989_s13 }
   0x8   : > { %s222_s18 = ssub.s32 %s993_s14, %s1073_s16  ;;  %p235_p0 = scmp.ne.s32.totalorder %s989_s13, %s985_s12 }
   0x9   : > { %p223_p1 = scmp.eq.s32.totalorder %s222_s18, 0  ;;  %p236_p2 = scmp.eq.s32.totalorder %s803_s8, 2 }
   0xa   : > { %p241_p3 = scmp.ne.s32.totalorder %s985_s12, %s981_s11  ;;  %p242_p4 = scmp.eq.s32.totalorder %s804_s15, 2 }
   0xb   : > { %s1085_s19 = scalar_select %p223_p1, %s989_s13, %s225_s17  }
   0xc   : > { %p1087_p5 = por %p236_p2, %p235_p0  ;;  %p1091_p6 = por %p242_p4, %p241_p3 }
   0xd   : > { %p807_p7 = scmp.ge.s32.totalorder %s993_s14, 1  ;;  %p293_p8 = scmp.lt.s32.totalorder %s993_s14, 4 }
   0xf   : > { %p294_p9 = pnand %p807_p7, %p293_p8 }
  0x10   : > { %s1132_s10 = sshll.u32 (!%p294_p9), %s803_s8, 1  ;;  %s326_s25 = sand.u32 (!%p294_p9), 1, %s985_s12  }
  0x11   : > { %297 = sbr.rel (%p294_p9) target bundleno = 654 (0x28e), region = 56  ;;  %p330_p10 = scmp.lt.s32.totalorder (!%p294_p9), %s1132_s10, 5 }
  0x12   : > { %s808_s26 = sshll.u32 (!%p294_p9), %s326_s25, 1  ;;  %s740_s29 = scalar_lea.hbm (!%p294_p9), %s1240_s9, %s1132_s10 }
  0x13   : > { %s328_s30 = scalar_lea.vmem (!%p294_p9), [#allocation3], %s808_s26  ;;  %s730_s18 = scalar_lea.sflag (!%p294_p9), [#allocation4], %s326_s25 }
  0x14   : > { %s951_s24 = scalar_lea.hbm (!%p294_p9), %s1240_s9, 6 }
  0x16   : > { %v344_v1 = vld [vmem:[%s1233_s2 + $0x18] sm:$0xff]  ;;  %v338_v3 = vld [vmem:[%s1232_s1 + $0x8] sm:$0xff]  ;;  %v995_v4 = vmov 0   ;;  %v339_v5 = vld [vmem:[%s1232_s1 + $0x10] sm:$0xff]  ;;  %v996_v7 = vmov 1   ;;  %s331_s15 = scalar_select %p330_p10, %s1132_s10, 5 }
  0x17   : > { %v340_v2 = vld [vmem:[%s1232_s1 + $0x18] sm:$0xff]  ;;  %877 = vset.pattern.permute.xlu2 %v995_v4  ;;  %875 = vset.pattern.permute.xlu1 %v995_v4  ;;  %v343_v6 = vld [vmem:[%s1233_s2 + $0x10] sm:$0xff]  ;;  %v342_v8 = vld [vmem:[%s1233_s2 + $0x8] sm:$0xff]  ;;  %vm482_vm0 = vcmask 261120   ;;  %vm721_vm1 = vcmask 1040384  }
  0x18   : > { %874 = vset.pattern.permute.xlu0 %v995_v4  ;;  %397 = vperm.xlu1 %875, %v344_v1   ;;  %v337_v9 = vld [vmem:[%s1232_s1] sm:$0xff]  ;;  %v460_v11 = vld [vmem:[%s1235_s4 + $0x10] sm:$0xff]  ;;  %v568_v12 = vld [vmem:[%s1237_s6 + $0x18] sm:$0xff]  ;;  %s810_s17 = sshll.u32 %s331_s15, 1  ;;  %s742_s15 = sshll.u32 %s328_s30, 4  ;;  %s743_s15 = int_to_ptr.vmem [resolvable:$true] %s742_s15 }
  0x19   : > { %362 = vperm.xlu0 %874, %v340_v2   ;;  %352 = vperm.xlu2 %877, %v338_v3   ;;  %v341_v10 = vld [vmem:[%s1233_s2] sm:$0xff]  ;;  %v566_v13 = vld [vmem:[%s1237_s6 + $0x8] sm:$0xff]  ;;  %s333_s23 = scalar_lea.vmem %s1231_s0, %s810_s17  ;;  %v461_v35 = vld [vmem:[%s1235_s4 + $0x18] sm:$0xff]  ;;  %s744_s17 = sshll.u32 %s740_s29, 4  ;;  %s745_s17 = int_to_ptr.hbm [resolvable:$true] %s744_s17 }
  0x1a   : > { %v336_v14 = vld [vmem:[%s333_s23] sm:$0xf]  ;;  %v459_v62 = vld [vmem:[%s1235_s4 + $0x8] sm:$0xff]  ;;  %s945_s22 = sshra.s32 %s745_s17, 4  ;;  %s946_s22 = int_to_ptr.hbm [resolvable:$true] %s945_s22 }
  0x1b   : > { %v366_v16 = vperm.slane %v336_v14, 0  ;;  %v367_v17 = vperm.slane %v336_v14, 2  ;;  %v424_v22 = vperm.slane %v336_v14, 1  ;;  %v425_v23 = vperm.slane %v336_v14, 3  ;;  %v458_v47 = vld [vmem:[%s1235_s4] sm:$0xff]  ;;  %s947_s10 = scalar_lea.hbm %s946_s22, 2  ;;  %p952_p0 = scmp.lt.s32.totalorder %s946_s22, %s1240_s9 }
  0x1c   : > { %v454_v14 = vld [vmem:[%s1234_s3] sm:$0xff]  ;;  %p948_p11 = scmp.ne.s32.totalorder %s946_s22, %s947_s10  ;;  %p953_p1 = scmp.lt.s32.totalorder %s951_s24, %s947_s10 }
  0x1d   : > { %v370_v20 = vperm.slane %v366_v16, 0  ;;  %v371_v21 = vperm.slane %v367_v17, 0  ;;  %v428_v26 = vperm.slane %v424_v22, 1  ;;  %v429_v27 = vperm.slane %v425_v23, 1  ;;  %v668_v17 = vld [vmem:[#allocation2] sm:$0x1] }
  0x1e   : > { %p949_p12 = pnand %p948_p11, %p1087_p5  ;;  %p954_p2 = por %p953_p1, %p952_p0 }
  0x20   : > { %876 = vset.pattern.permute.xlu1 %v996_v7  ;;  %p950_p13 = pneg %p949_p12 }
  0x21   : > { %357 = vperm.xlu0 %874, %v339_v5   ;;  %392 = vperm.xlu2 %877, %v343_v6  }
  0x22   : > { %421 = vperm.xlu1 %876, %v340_v2   ;;  %p955_p3 = pnand %p954_p2, %p950_p13 }
  0x29   : > { %878 = vset.pattern.permute.xlu0 %v996_v7  ;;  %387 = vperm.xlu2 %877, %v342_v8  }
  0x2a   : > { %879 = vset.pattern.permute.xlu1 %v995_v4  ;;  %417 = vperm.xlu0 %878, %v339_v5  }
  0x2b   : > { %347 = vperm.xlu1 %879, %v337_v9  }
  0x31   : > { %382 = vperm.xlu2 %877, %v341_v10   ;;  %v567_v10 = vld [vmem:[%s1237_s6 + $0x10] sm:$0xff] }
  0x32   : > { %409 = vperm.xlu0 %878, %v337_v9  }
  0x33   : > { %880 = vset.pattern.permute.xlu1 %v996_v7 }
  0x34   : > { %413 = vperm.xlu1 %880, %v338_v3  }
  0x39   : > { %474 = vperm.xlu2 %877, %v460_v11   ;;  %v565_v11 = vld [vmem:[%s1237_s6] sm:$0xff] }
  0x3a   : > { %882 = vset.pattern.permute.xlu0 %v995_v4 }
  0x3b   : > { %469 = vperm.xlu0 %882, %v459_v62  }
  0x3c   : > { %881 = vset.pattern.permute.xlu1 %v995_v4 }
  0x3d   : > { %479 = vperm.xlu1 %881, %v461_v35  }
  0x41   : > { %586 = vperm.xlu2 %877, %v568_v12  }
  0x43   : > { %571 = vperm.xlu0 %882, %v565_v11  }
  0x45   : > { %464 = vperm.xlu1 %881, %v458_v47   ;;  %v561_v47 = vld [vmem:[%s1236_s5] sm:$0xff] }
  0x49   : > { %576 = vperm.xlu2 %877, %v566_v13  }
  0x4d   : > { %581 = vperm.xlu1 %881, %v567_v10  }
  0x55   : > { %671 = vperm.xlu1 %881, %v668_v17  }
  0x73   : > { %v353_v15 = vpop.permute.xlu2 %352 }
  0x74   : > { %v374_v52 = vmul.f32 %v370_v20, %v353_v15  ;;  %v375_v53 = vmul.f32 %v371_v21, %v353_v15 }
  0x7b   : > { %v393_v28 = vpop.permute.xlu2 %392 }
  0x83   : > { %v388_v40 = vpop.permute.xlu2 %387 }
  0x84   : > { %v402_v58 = vadd.f32 %v388_v40, %v374_v52  ;;  %v403_v0 = vadd.f32 %v388_v40, %v375_v53  ;;  %v564_v52 = vld [vmem:[%s1236_s5 + $0x18] sm:$0xff] }
  0x8a   : > { %v398_v18 = vpop.permute.xlu1 %397 }
  0x8b   : > { %v363_v19 = vpop.permute.xlu0 %362  ;;  %v383_v59 = vpop.permute.xlu2 %382 }
  0x8c   : > { %v378_v24 = vmul.f32 %v370_v20, %v363_v19  ;;  %v379_v25 = vmul.f32 %v371_v21, %v363_v19  ;;  %v456_v19 = vld [vmem:[%s1234_s3 + $0x10] sm:$0xff] }
  0x8e   : > { %v406_v33 = vadd.f32 %v398_v18, %v378_v24  ;;  %v407_v34 = vadd.f32 %v398_v18, %v379_v25  ;;  %v455_v18 = vld [vmem:[%s1234_s3 + $0x8] sm:$0xff] }
  0x93   : > { %v358_v29 = vpop.permute.xlu0 %357 }
  0x94   : > { %v422_v30 = vpop.permute.xlu1 %421  ;;  %v376_v38 = vmul.f32 %v370_v20, %v358_v29  ;;  %v377_v39 = vmul.f32 %v371_v21, %v358_v29 }
  0x95   : > { %v436_v31 = vmul.f32 %v428_v26, %v422_v30  ;;  %v437_v32 = vmul.f32 %v429_v27, %v422_v30 }
  0x96   : > { %v404_v42 = vadd.f32 %v393_v28, %v376_v38  ;;  %v405_v43 = vadd.f32 %v393_v28, %v377_v39  ;;  %v475_v28 = vpop.permute.xlu2 %474 }
  0x97   : > { %v444_v36 = vadd.f32 %v436_v31, %v406_v33  ;;  %v445_v37 = vadd.f32 %v437_v32, %v407_v34 }
  0x99   : > { %883 = vtanh.f32 %v444_v36 }
  0x9a   : > { %885 = vtanh.f32 %v445_v37 }
  0x9c   : > { %v418_v41 = vpop.permute.xlu0 %417 }
  0x9d   : > { %v434_v44 = vmul.f32 %v428_v26, %v418_v41  ;;  %v435_v45 = vmul.f32 %v429_v27, %v418_v41  ;;  %v348_v46 = vpop.permute.xlu1 %347 }
  0x9e   : > { %v372_v54 = vmul.f32 %v370_v20, %v348_v46  ;;  %v373_v55 = vmul.f32 %v371_v21, %v348_v46  ;;  %v457_v20 = vld [vmem:[%s1234_s3 + $0x18] sm:$0xff] }
  0x9f   : > { %v884_v48 = vpop.eup %883  ;;  %v442_v49 = vadd.f32 %v434_v44, %v404_v42  ;;  %v443_v50 = vadd.f32 %v435_v45, %v405_v43 }
  0xa0   : > { %v886_v51 = vpop.eup %885  ;;  %507 = vmatpush.msra.mxu0 %v884_v48  ;;  %v400_v1 = vadd.f32 %v383_v59, %v372_v54  ;;  %v401_v5 = vadd.f32 %v383_v59, %v373_v55 }
  0xa1   : > { %887 = vtanh.f32 %v442_v49  ;;  %536 = vmatpush.msra.mxu1 %v886_v51  ;;  %v563_v51 = vld [vmem:[%s1236_s5 + $0x10] sm:$0xff] }
  0xa2   : > { %889 = vtanh.f32 %v443_v50  ;;  %v562_v50 = vld [vmem:[%s1236_s5 + $0x8] sm:$0xff] }
  0xa4   : > { %v410_v56 = vpop.permute.xlu0 %409 }
  0xa5   : > { %v430_v57 = vmul.f32 %v428_v26, %v410_v56  ;;  %v431_v60 = vmul.f32 %v429_v27, %v410_v56 }
  0xa6   : > { %v414_v61 = vpop.permute.xlu1 %413 }
  0xa7   : > { %v888_v63 = vpop.eup %887  ;;  %v432_v2 = vmul.f32 %v428_v26, %v414_v61  ;;  %v433_v3 = vmul.f32 %v429_v27, %v414_v61  ;;  %v438_v6 = vadd.f32 %v430_v57, %v400_v1  ;;  %v439_v9 = vadd.f32 %v431_v60, %v401_v5  ;;  %v587_v57 = vpop.permute.xlu2 %586 }
  0xa8   : > { %v890_v4 = vpop.eup %889  ;;  %508 = vmatpush.msra.mxu0 %v888_v63 }
  0xa9   : > { %v440_v7 = vadd.f32 %v432_v2, %v402_v58  ;;  %v441_v8 = vadd.f32 %v433_v3, %v403_v0  ;;  %537 = vmatpush.msra.mxu1 %v890_v4 }
  0xab   : > { %891 = vtanh.f32 %v440_v7 }
  0xac   : > { %893 = vtanh.f32 %v441_v8 }
  0xad   : > { %895 = vtanh.f32 %v438_v6  ;;  %v470_v30 = vpop.permute.xlu0 %469 }
  0xae   : > { %897 = vtanh.f32 %v439_v9 }
  0xaf   : > { %v480_v26 = vpop.permute.xlu1 %479  ;;  %v577_v1 = vpop.permute.xlu2 %576 }
  0xb1   : > { %v892_v12 = vpop.eup %891 }
  0xb2   : > { %v894_v13 = vpop.eup %893  ;;  %509 = vmatpush.msra.mxu0 %v892_v12 }
  0xb3   : > { %v896_v15 = vpop.eup %895  ;;  %538 = vmatpush.msra.mxu1 %v894_v13 }
  0xb4   : > { %v898_v16 = vpop.eup %897  ;;  %510 = vmatpush.msra.mxu0 %v896_v15  ;;  %v667_v15 = vld [vmem:[%s1238_s7] sm:$0x1] }
  0xb5   : > { %539 = vmatpush.msra.mxu1 %v898_v16  ;;  %811 = vmatmul.msk.f32.vlgmr.msra.gmra.mxu0 %vm482_vm0, %v454_v14  ;;  %v572_v5 = vpop.permute.xlu0 %571 }
  0xb6   : > { %815 = vmatmul.msk.f32.vlgmr.msra.gmra.mxu1 %vm482_vm0, %v454_v14 }
  0xb7   : > { %v465_v36 = vpop.permute.xlu1 %464 }
  0xbd   : > { %812 = vmatmul.msk.f32.gmra.mxu0 %vm482_vm0, %v455_v18 }
  0xbe   : > { %816 = vmatmul.msk.f32.gmra.mxu1 %vm482_vm0, %v455_v18 }
  0xbf   : > { %v582_v60 = vpop.permute.xlu1 %581 }
  0xc5   : > { %813 = vmatmul.msk.f32.gmra.mxu0 %vm482_vm0, %v456_v19 }
  0xc6   : > { %817 = vmatmul.msk.f32.gmra.mxu1 %vm482_vm0, %v456_v19 }
  0xc7   : > { %v672_v18 = vpop.permute.xlu1 %671 }
  0xc8   : > { %v674_v19 = vperm.slane %v672_v18, 0 }
  0xcd   : > { %814 = vmatmul.msk.f32.gmra.mxu0 %vm482_vm0, %v457_v20 }
  0xce   : > { %818 = vmatmul.msk.f32.gmra.mxu1 %vm482_vm0, %v457_v20  ;;  %v724_v20 = vlaneseq }
  0xd0   : > { %vm726_vm2 = vcmp.lt.s32.totalorder %v724_v20, 256 }
 0x132   : > { %v512_v21 = vpop.f32.mrf.mxu0 }
 0x133   : > { %v541_v22 = vpop.f32.mrf.mxu1  ;;  %v513_v39 = vadd.f32 %v512_v21, %v465_v36 }
 0x134   : > { %v542_v40 = vadd.f32 %v541_v22, %v465_v36 }
 0x13a   : > { %v515_v23 = vpop.f32.mrf.mxu0 }
 0x13b   : > { %v544_v24 = vpop.f32.mrf.mxu1  ;;  %v516_v37 = vadd.f32 %v515_v23, %v470_v30 }
 0x13c   : > { %v545_v38 = vadd.f32 %v544_v24, %v470_v30 }
 0x142   : > { %v518_v25 = vpop.f32.mrf.mxu0 }
 0x143   : > { %v547_v27 = vpop.f32.mrf.mxu1  ;;  %v519_v31 = vadd.f32 %v518_v25, %v475_v28 }
 0x144   : > { %v548_v34 = vadd.f32 %v547_v27, %v475_v28 }
 0x14a   : > { %v521_v29 = vpop.f32.mrf.mxu0 }
 0x14b   : > { %v522_v32 = vadd.f32 %v521_v29, %v480_v26  ;;  %v550_v33 = vpop.f32.mrf.mxu1 }
 0x14c   : > { %v551_v35 = vadd.f32 %v550_v33, %v480_v26 }
 0x14d   : > { %899 = vtanh.f32 %v522_v32 }
 0x14e   : > { %901 = vtanh.f32 %v551_v35 }
 0x14f   : > { %903 = vtanh.f32 %v519_v31 }
 0x150   : > { %905 = vtanh.f32 %v548_v34 }
 0x151   : > { %907 = vtanh.f32 %v516_v37 }
 0x152   : > { %909 = vtanh.f32 %v545_v38 }
 0x153   : > { %v900_v41 = vpop.eup %899  ;;  %911 = vtanh.f32 %v513_v39 }
 0x154   : > { %v902_v42 = vpop.eup %901  ;;  %913 = vtanh.f32 %v542_v40  ;;  %613 = vmatpush.msra.mxu2 %v900_v41 }
 0x155   : > { %v904_v43 = vpop.eup %903  ;;  %642 = vmatpush.msra.mxu3 %v902_v42 }
 0x156   : > { %v906_v44 = vpop.eup %905  ;;  %614 = vmatpush.msra.mxu2 %v904_v43 }
 0x157   : > { %v908_v45 = vpop.eup %907  ;;  %643 = vmatpush.msra.mxu3 %v906_v44 }
 0x158   : > { %v910_v46 = vpop.eup %909  ;;  %615 = vmatpush.msra.mxu2 %v908_v45 }
 0x159   : > { %v912_v48 = vpop.eup %911  ;;  %644 = vmatpush.msra.mxu3 %v910_v46 }
 0x15a   : > { %v914_v49 = vpop.eup %913  ;;  %616 = vmatpush.msra.mxu2 %v912_v48 }
 0x15b   : > { %645 = vmatpush.msra.mxu3 %v914_v49  ;;  %819 = vmatmul.msk.f32.vlgmr.msra.gmra.mxu2 %vm482_vm0, %v561_v47 }
 0x15c   : > { %823 = vmatmul.msk.f32.vlgmr.msra.gmra.mxu3 %vm482_vm0, %v561_v47 }
 0x163   : > { %820 = vmatmul.msk.f32.gmra.mxu2 %vm482_vm0, %v562_v50 }
 0x164   : > { %824 = vmatmul.msk.f32.gmra.mxu3 %vm482_vm0, %v562_v50 }
 0x16b   : > { %821 = vmatmul.msk.f32.gmra.mxu2 %vm482_vm0, %v563_v51 }
 0x16c   : > { %825 = vmatmul.msk.f32.gmra.mxu3 %vm482_vm0, %v563_v51 }
 0x173   : > { %822 = vmatmul.msk.f32.gmra.mxu2 %vm482_vm0, %v564_v52 }
 0x174   : > { %826 = vmatmul.msk.f32.gmra.mxu3 %vm482_vm0, %v564_v52 }
 0x1de   : > { %v618_v53 = vpop.f32.mrf.mxu2 }
 0x1df   : > { %v647_v54 = vpop.f32.mrf.mxu3  ;;  %v619_v7 = vadd.f32 %v618_v53, %v572_v5 }
 0x1e0   : > { %v648_v8 = vadd.f32 %v647_v54, %v572_v5 }
 0x1e6   : > { %v621_v55 = vpop.f32.mrf.mxu2 }
 0x1e7   : > { %v650_v56 = vpop.f32.mrf.mxu3  ;;  %v622_v4 = vadd.f32 %v621_v55, %v577_v1 }
 0x1e8   : > { %v651_v6 = vadd.f32 %v650_v56, %v577_v1 }
 0x1ee   : > { %v624_v58 = vpop.f32.mrf.mxu2 }
 0x1ef   : > { %v653_v59 = vpop.f32.mrf.mxu3  ;;  %v625_v62 = vadd.f32 %v624_v58, %v582_v60 }
 0x1f0   : > { %v654_v2 = vadd.f32 %v653_v59, %v582_v60 }
 0x1f6   : > { %v627_v61 = vpop.f32.mrf.mxu2 }
 0x1f7   : > { %v628_v63 = vadd.f32 %v627_v61, %v587_v57  ;;  %v656_v0 = vpop.f32.mrf.mxu3 }
 0x1f8   : > { %v657_v3 = vadd.f32 %v656_v0, %v587_v57 }
 0x1f9   : > { %915 = vtanh.f32 %v628_v63 }
 0x1fa   : > { %917 = vtanh.f32 %v657_v3 }
 0x1fb   : > { %919 = vtanh.f32 %v625_v62 }
 0x1fc   : > { %921 = vtanh.f32 %v654_v2 }
 0x1fd   : > { %923 = vtanh.f32 %v622_v4 }
 0x1fe   : > { %925 = vtanh.f32 %v651_v6 }
 0x1ff   : > { %v916_v9 = vpop.eup %915  ;;  %927 = vtanh.f32 %v619_v7 }
 0x200   : > { %v918_v10 = vpop.eup %917  ;;  %929 = vtanh.f32 %v648_v8  ;;  %690 = vmatpush.msrb.mxu0 %v916_v9 }
 0x201   : > { %v920_v11 = vpop.eup %919  ;;  %710 = vmatpush.msrb.mxu1 %v918_v10 }
 0x202   : > { %v922_v12 = vpop.eup %921  ;;  %691 = vmatpush.msrb.mxu0 %v920_v11 }
 0x203   : > { %v924_v13 = vpop.eup %923  ;;  %711 = vmatpush.msrb.mxu1 %v922_v12 }
 0x204   : > { %v926_v14 = vpop.eup %925  ;;  %692 = vmatpush.msrb.mxu0 %v924_v13 }
 0x205   : > { %v928_v16 = vpop.eup %927  ;;  %712 = vmatpush.msrb.mxu1 %v926_v14 }
 0x206   : > { %v930_v17 = vpop.eup %929  ;;  %693 = vmatpush.msrb.mxu0 %v928_v16 }
 0x207   : > { %713 = vmatpush.msrb.mxu1 %v930_v17  ;;  %827 = vmatmul.msk.f32.vlgmr.msrb.gmra.mxu0 %vm482_vm0, %v667_v15 }
 0x208   : > { %828 = vmatmul.msk.f32.vlgmr.msrb.gmra.mxu1 %vm482_vm0, %v667_v15 }
 0x284   : > { %v695_v21 = vpop.f32.mrf.mxu0 }
 0x285   : > { %v715_v22 = vpop.f32.mrf.mxu1  ;;  %v696_v24 = vadd.f32 %v695_v21, %v674_v19 }
 0x286   : > { %v716_v23 = vadd.f32 %v715_v22, %v674_v19 }
 0x288   : > { %v720_v25 = vrot.slane %v716_v23, 7 }
 0x28a   : > { %v722_v26 = vsel %vm721_vm1, %v696_v24, %v720_v25 }
 0x28b   : > { %728 = vst.msk [vmem:[%s328_s30] sm:$0x3] %vm726_vm2, %v722_v26 }
 0x28c   : > { %958 = shalt.err (!%p955_p3)
}
 0x28d   : > { %833 = dma.vmem_to_hbm [thread:$0]  (%p1087_p5), %s743_s15, 32, %s745_s17, %s730_s18  }
 0x28e PF: > { %p839_p4 = scmp.ge.s32.totalorder %s993_s14, 2  ;;  %s756_s25 = sand.u32 1, %s981_s11  }
 0x28f   : > { %s757_s28 = scalar_lea.sflag [#allocation4], %s756_s25 }
 0x290   : > { %p836_p7 = pnand %p839_p4, %p1091_p6 }
 0x292   : > { %p837_p8 = pneg %p836_p7 }
 0x294   : > { %976 = dma.done.wait (%p837_p8), %s757_s28, 32  }
 0x295   : > { %978 = vsyncadd (%p837_p8), %s757_s28, 4294967264  ;;  %p21_p9 = scmp.ge.s32.totalorder %s1073_s16, 5   ;;  %s1243_s11 = smov %s985_s12 }
 0x296   : > { %s1244_s12 = smov %s989_s13  ;;  %s1245_s13 = smov %s1085_s19 }
 0x297   : > { %s1246_s14 = smov %s1073_s16  ;;  %23 = sbr.rel (!%p21_p9) target bundleno = 6 (0x6), region = 91 }
 0x29c   :  { %763 = vsyncpa [#allocation4], 1 }
 0x29d   :  { %765 = vsyncpa [#allocation4 + $0x1], 1 }

</bundles_post_ra>
